<compile_context>
chip_gen: v7x
topology: tpu7x:2x2x1
jax: 0.10.0
libtpu: 0.0.40
codegen_flags: <defaults>
</compile_context>

<pallas_src>
import functools
from typing import NamedTuple

import numpy as np
import jax
import jax.numpy as jnp
from jax import lax
from jax.experimental import pallas as pl
from jax.experimental.pallas import tpu as pltpu

LANE = 128


class Membership(NamedTuple):
    elements: jnp.ndarray
    degrees: jnp.ndarray
    mask: jnp.ndarray


class CompoundParams(NamedTuple):
    mask_all: jnp.ndarray      # (VT, P) f32, lane-concatenated [min | prod | 0-pad]
    stacked_mask: jnp.ndarray  # (2, V, T, R) — torch.stack of applied_masks
    n_relations: int           # R per NAryRelation


def make_compound_params(mask_min: np.ndarray, mask_prod: np.ndarray) -> CompoundParams:
    """Static (per-model, not per-call) preparation of the relation masks."""
    V, T, R = mask_min.shape
    VT = V * T
    P = LANE * pl.cdiv(2 * R, LANE)          # pad relation axis to lane width
    mask_all = np.zeros((VT, P), np.float32)
    mask_all[:, :R] = np.asarray(mask_min, np.float32).reshape(VT, R)
    mask_all[:, R:2 * R] = np.asarray(mask_prod, np.float32).reshape(VT, R)
    stacked = jnp.stack([jnp.asarray(mask_min, jnp.float32),
                         jnp.asarray(mask_prod, jnp.float32)])
    return CompoundParams(jnp.asarray(mask_all), stacked, R)


def _compound_kernel(deg_ref, mask_ref, out_ref, *, n_min_cols: int):
    """
    deg_ref  : (TB, VT)  f32  membership degrees (flattened (variable, term))
    mask_ref : (VT, P)   f32  0/1 masks; cols [0,R) = Minimum relation,
                              [R,2R) = Product relation, [2R,P) = zero pad
    out_ref  : (TB, P)   f32  [min degrees | product degrees | identity pad]
    """
    deg = deg_ref[...]                                   # (TB, VT)
    sel = (mask_ref[...] != 0.0)[None, :, :]             # (1, VT, P) bool

    # Vectorized masked select: identity (1.0) wherever a relation does not
    # use the (variable, term) entry.  One full-slab select — no per-vt
    # lane extraction / broadcast.
    masked = jnp.where(sel, deg[:, :, None], 1.0)        # (TB, VT, P)

    # Minimum t-norm: sublane-axis min reduction (VPU/XLU).
    red_min = jnp.min(masked, axis=1)                    # (TB, P)

    # Product t-norm in the log domain: sum reduction + EUP log/exp.
    # Masked-out entries are exactly 1.0 (log == 0); deg == 0 -> -inf -> 0.
    red_prod = jnp.exp(jnp.sum(jnp.log(masked), axis=1))  # (TB, P)

    # Single lane-dense, full-width store (no masked partial stores).
    col = lax.broadcasted_iota(jnp.int32, red_min.shape, 1)
    out_ref[...] = jnp.where(col < n_min_cols, red_min, red_prod)


def compound_forward(membership: Membership, params: CompoundParams) -> Membership:
    """JAX/Pallas equivalent of Compound(Minimum(mask_min), Product(mask_prod))."""
    B, V, T = membership.degrees.shape
    VT = V * T
    R = params.n_relations
    P = params.mask_all.shape[-1]

    deg_flat = membership.degrees.reshape(B, VT).astype(jnp.float32)

    # Batch tile: whole batch when small, otherwise 256-row tiles so the
    # (TB, VT, P) f32 intermediate (+ double-buffered deg/out blocks) fits
    # comfortably in the scoped VMEM of every generation (incl. v7x's 64 MiB).
    TB = min(B, 256)
    grid = (pl.cdiv(B, TB),)

    out = pl.pallas_call(
        functools.partial(_compound_kernel, n_min_cols=R),
        out_shape=jax.ShapeDtypeStruct((B, P), jnp.float32),
        grid=grid,
        in_specs=[
            pl.BlockSpec((TB, VT), lambda i: (i, 0)),   # degrees: tiled over batch
            pl.BlockSpec((VT, P), lambda i: (0, 0)),    # masks: VMEM-resident
        ],
        out_specs=pl.BlockSpec((TB, P), lambda i: (i, 0)),
        compiler_params=pltpu.CompilerParams(
            dimension_semantics=("parallel",),          # megacore / v7x 2-TC sharding
        ),
    )(deg_flat, params.mask_all)

    # torch.cat([m.degrees ...], dim=-1).unsqueeze(dim=-1)  (drop lane padding)
    degrees = out[:, :2 * R][:, :, None]
    # torch.stack([relation.applied_mask for relation in self.relations])
    return Membership(elements=membership.elements, degrees=degrees,
                      mask=params.stacked_mask)


if __name__ == "__main__":
    B, V, T, R = 8, 4, 4, 4  # batch, fuzzy variables, terms, relations per NAryRelation

    key = jax.random.PRNGKey(0)
    k_elem, k_deg = jax.random.split(key)
    elements = jax.random.normal(k_elem, (B, V), dtype=jnp.float32)
    degrees = jax.random.uniform(k_deg, (B, V, T), dtype=jnp.float32)

    # Deterministic relation masks: output relation r of each NAryRelation
    # selects exactly one term per variable.
    mm = np.zeros((V, T, R), np.float32)
    mp = np.zeros((V, T, R), np.float32)
    for r in range(R):
        for v in range(V):
            mm[v, (v + r) % T, r] = 1.0          # Minimum relation mask
            mp[v, (2 * v + r) % T, r] = 1.0      # Product relation mask

    params = make_compound_params(mm, mp)        # static, done once
    membership = Membership(elements=elements, degrees=degrees,
                            mask=jnp.ones((V, T), jnp.float32))

    out = compound_forward(membership, params)
    jax.block_until_ready(out.degrees)

    # Pure-JAX reference for correctness.
    d3 = degrees.reshape(B, V * T, 1)
    mmf = jnp.asarray(mm).reshape(V * T, R)[None]
    mpf = jnp.asarray(mp).reshape(V * T, R)[None]
    ref_min = jnp.min(jnp.where(mmf != 0.0, d3, 1.0), axis=1)
    ref_prod = jnp.prod(jnp.where(mpf != 0.0, d3, 1.0), axis=1)
    ref = jnp.concatenate([ref_min, ref_prod], axis=-1)[:, :, None]

    assert out.degrees.shape == (B, 2 * R, 1)
    assert out.mask.shape == (2, V, T, R)
    # rtol accounts for the log-domain product (exp(sum(log))) rounding.
    np.testing.assert_allclose(np.asarray(out.degrees), np.asarray(ref),
                               rtol=2e-5, atol=1e-6)
    # TODO(synk): Compound is a generic container over arbitrary NAryRelation
    # submodules; only Minimum/Product t-norm relations are materialized here.
    print("KERNEL_OK")
</pallas_src>

<mosaic_0001>
module attributes {stable_mosaic.version = 11 : i64} {
  func.func @_compound_kernel(%arg0: i32, %arg1: memref<8x16xf32, #tpu.memory_space<vmem>>, %arg2: memref<16x128xf32, #tpu.memory_space<vmem>>, %arg3: memref<8x128xf32, #tpu.memory_space<vmem>>) attributes {dimension_semantics = [#tpu.dimension_semantics<parallel>], iteration_bounds = array<i64: 1>, scalar_prefetch = 0 : i64, scratch_operands = 0 : i64, tpu.core_type = #tpu.core_type<tc>, window_params = [{transform_indices = @transform_0, window_bounds = array<i64: 8, 16>}, {pipeline_mode = #tpu.pipeline_mode<synchronous>, transform_indices = @transform_1, window_bounds = array<i64: 16, 128>}, {transform_indices = @transform_2, window_bounds = array<i64: 8, 128>}]} {
    %c0 = arith.constant 0 : index
    %c0_0 = arith.constant 0 : index
    %0 = vector.load %arg1[%c0, %c0_0] : memref<8x16xf32, #tpu.memory_space<vmem>>, vector<8x16xf32>
    %c0_1 = arith.constant 0 : index
    %c0_2 = arith.constant 0 : index
    %1 = vector.load %arg2[%c0_1, %c0_2] : memref<16x128xf32, #tpu.memory_space<vmem>>, vector<16x128xf32>
    %cst = arith.constant 0.000000e+00 : f32
    %2 = vector.broadcast %cst : f32 to vector<16x128xf32>
    %3 = arith.cmpf one, %1, %2 : vector<16x128xf32>
    %4 = vector.shape_cast %3 : vector<16x128xi1> to vector<1x16x128xi1>
    %5 = vector.shape_cast %0 : vector<8x16xf32> to vector<8x16x1xf32>
    %cst_3 = arith.constant 1.000000e+00 : f32
    %6 = vector.shape_cast %4 : vector<1x16x128xi1> to vector<1x16x128xi1>
    %7 = vector.broadcast %6 : vector<1x16x128xi1> to vector<8x16x128xi1>
    %8 = vector.shape_cast %5 : vector<8x16x1xf32> to vector<8x16x1xf32>
    %9 = vector.broadcast %8 : vector<8x16x1xf32> to vector<8x16x128xf32>
    %10 = vector.broadcast %cst_3 : f32 to vector<8x16x128xf32>
    %11 = arith.select %7, %9, %10 : vector<8x16x128xi1>, vector<8x16x128xf32>
    %cst_4 = arith.constant dense<0x7F800000> : vector<8x128xf32>
    %12 = vector.multi_reduction <minimumf>, %11, %cst_4 [1] : vector<8x16x128xf32> to vector<8x128xf32>
    %13 = math.log %11 : vector<8x16x128xf32>
    %cst_5 = arith.constant dense<0.000000e+00> : vector<8x128xf32>
    %14 = vector.multi_reduction <add>, %13, %cst_5 [1] : vector<8x16x128xf32> to vector<8x128xf32>
    %15 = math.exp %14 : vector<8x128xf32>
    %16 = tpu.iota {dimensions = array<i32: 1>} : vector<8x128xi32>
    %c4_i32 = arith.constant 4 : i32
    %17 = vector.broadcast %c4_i32 : i32 to vector<8x128xi32>
    %18 = arith.cmpi slt, %16, %17 : vector<8x128xi32>
    %19 = arith.select %18, %12, %15 : vector<8x128xi1>, vector<8x128xf32>
    %c0_6 = arith.constant 0 : index
    %c0_7 = arith.constant 0 : index
    %20 = vector.load %arg3[%c0_6, %c0_7] : memref<8x128xf32, #tpu.memory_space<vmem>>, vector<8x128xf32>
    tpu.vector_store %arg3[%c0_6, %c0_7], %19 {strides = array<i32>} : memref<8x128xf32, #tpu.memory_space<vmem>>, vector<8x128xf32>,
    return
  }
  func.func @transform_0(%arg0: i32) -> (i32, i32) {
    %c0_i32 = arith.constant 0 : i32
    %c0_i32_0 = arith.constant 0 : i32
    return %arg0, %c0_i32 : i32, i32
  }
  func.func @transform_1(%arg0: i32) -> (i32, i32) {
    %c0_i32 = arith.constant 0 : i32
    %c0_i32_0 = arith.constant 0 : i32
    %c0_i32_1 = arith.constant 0 : i32
    return %c0_i32, %c0_i32_0 : i32, i32
  }
  func.func @transform_2(%arg0: i32) -> (i32, i32) {
    %c0_i32 = arith.constant 0 : i32
    %c0_i32_0 = arith.constant 0 : i32
    return %arg0, %c0_i32 : i32, i32
  }
}

</mosaic_0001>

<bundles_post_ra>
// kernel: tpu_custom_call.1
= control target key start
LH: loop header
LB: loop body
LE: loop exit
PB: predicated region body
PF: predicated region fallthrough
CT: control target
= control target key end

     0   :  { %7 = vsyncpa [#allocation3], 0  ;;  %s665_s0 = inlined_call_operand.hbm [shape: f32[8,16], index: 0, kind: input, shape index: {}]   ;;  %s666_s1 = inlined_call_operand.hbm [shape: f32[16,128], index: 1, kind: input, shape index: {}]   ;;  %s667_s2 = inlined_call_operand.hbm [shape: f32[8,128], index: 2, kind: output, shape index: {}]  }
   0x1   :  { %8 = vsyncpa [#allocation6], 0 }
   0x2   :  { %9 = vsyncpa [#allocation4], 0  ;;  %s496_s9 = smov [#allocation2]   ;;  %s497_s11 = smov [#allocation5]  }
   0x3   :  { %s16_s10 = sshll.u32 %s496_s9, 4  ;;  %s25_s12 = sshll.u32 %s497_s11, 4  ;;  %s17_s10 = int_to_ptr.vmem [resolvable:$true] %s16_s10  ;;  %s516_s12 = int_to_ptr.vmem [resolvable:$true] %s25_s12 }
   0x4   :  { %s424_s15 = scalar_lea.hbm %s665_s0, 128 }
   0x5   :  { %p425_p0 = scmp.ne.s32.totalorder %s665_s0, %s424_s15  ;;  %p428_p1 = scmp.lt.u32.totalorder %s424_s15, %s665_s0 }
   0x7   :  { %p430_p2 = pnand %p428_p1, %p425_p0 }
   0x9   :  { %433 = shalt.err (!%p430_p2)
}
   0xa   :  { %s434_s20 = scalar_lea.vmem %s17_s10, 128  ;;  %p439_p4 = scmp.lt.s32.totalorder %s17_s10, %s17_s10 }
   0xb   :  { %p435_p3 = scmp.ne.s32.totalorder %s17_s10, %s434_s20  ;;  %p440_p5 = scmp.lt.s32.totalorder %s434_s20, %s434_s20 }
   0xd   :  { %p441_p6 = por %p440_p5, %p439_p4 }
   0xf   :  { %p442_p7 = pnand %p441_p6, %p435_p3 }
  0x11   :  { %445 = shalt.err (!%p442_p7)
}
  0x12   :  { %19 = dma.hbm_to_vmem [thread:$0]  %s665_s0, 128, %s17_s10, [#allocation3]  }
  0x13   :  { %s446_s25 = scalar_lea.hbm %s666_s1, 256 }
  0x14   :  { %p447_p8 = scmp.ne.s32.totalorder %s666_s1, %s446_s25  ;;  %p450_p9 = scmp.lt.u32.totalorder %s446_s25, %s666_s1 }
  0x16   :  { %p452_p10 = pnand %p450_p9, %p447_p8 }
  0x18   :  { %455 = shalt.err (!%p452_p10)
}
  0x19   :  { %s456_s30 = scalar_lea.vmem %s516_s12, 256  ;;  %p461_p12 = scmp.lt.s32.totalorder %s516_s12, %s516_s12 }
  0x1a   :  { %p457_p11 = scmp.ne.s32.totalorder %s516_s12, %s456_s30  ;;  %p462_p13 = scmp.lt.s32.totalorder %s456_s30, %s456_s30 }
  0x1c   :  { %p463_p0 = por %p462_p13, %p461_p12 }
  0x1e   :  { %p464_p1 = pnand %p463_p0, %p457_p11 }
  0x20   :  { %467 = shalt.err (!%p464_p1)
}
  0x21   :  { %s498_s0 = smov 128   ;;  %s499_s3 = smov 8  }
  0x22   :  { %31 = dma.hbm_to_vmem [thread:$0]  %s666_s1, 256, %s516_s12, [#allocation6], %s498_s0, %s498_s0, %s499_s3  }
  0x23   :  { %490 = dma.done.wait [#allocation3], 128  }
  0x24   :  { %491 = vsyncadd [#allocation3], 4294967168 }
  0x25   :  { %492 = dma.done.wait [#allocation6], 256  }
  0x26   :  { %493 = vsyncadd [#allocation6], 4294967040  ;;  %v43_v0 = vlaneseq  ;;  %v38_v4 = vld [vmem:[#allocation2] sm:$0xff]  ;;  %v548_v21 = vld [vmem:[#allocation5] sm:$0xff]  ;;  %vm322_vm2 = vcmask 1041409   ;;  %vm324_vm3 = vcmask 1042434  }
  0x27   :  { %v550_v22 = vld [vmem:[#allocation5 + $0x8] sm:$0xff]  ;;  %vm41_vm0 = vcmp.ne.f32.partialorder %v548_v21, 0.0  ;;  %vm326_vm4 = vcmask 1043459   ;;  %vm328_vm5 = vcmask 1044484   ;;  %vm330_vm6 = vcmask 1045509   ;;  %s500_s1 = smov [#allocation7]  }
  0x28   :  { %v44_v1 = vshrl.u32 %v43_v0, 7  ;;  %vm42_vm1 = vcmp.ne.f32.partialorder %v550_v22, 0.0  ;;  %vm332_vm7 = vcmask 1046534   ;;  %vm334_vm8 = vcmask 1047559   ;;  %s361_s6 = sshll.u32 %s500_s1, 4  ;;  %s362_s6 = int_to_ptr.vmem [resolvable:$true] %s361_s6 }
  0x29   :  { %s468_s7 = scalar_lea.vmem %s362_s6, 128  ;;  %p473_p3 = scmp.lt.s32.totalorder %s362_s6, %s362_s6 }
  0x2a   :  { %v56_v2 = vsub.s32 1, %v44_v1  ;;  %v45_v3 = vsub.s32 0, %v44_v1  ;;  %v67_v7 = vsub.s32 2, %v44_v1  ;;  %v78_v9 = vsub.s32 3, %v44_v1  ;;  %p469_p2 = scmp.ne.s32.totalorder %s362_s6, %s468_s7  ;;  %p474_p4 = scmp.lt.s32.totalorder %s468_s7, %s468_s7 }
  0x2b   :  { %v89_v11 = vsub.s32 4, %v44_v1  ;;  %v100_v13 = vsub.s32 5, %v44_v1  ;;  %v111_v15 = vsub.s32 6, %v44_v1  ;;  %v122_v17 = vsub.s32 7, %v44_v1 }
  0x2c   :  { %v57_v5 = vrot.slane %v38_v4, %v56_v2  ;;  %v46_v6 = vrot.slane %v38_v4, %v45_v3  ;;  %v68_v8 = vrot.slane %v38_v4, %v67_v7  ;;  %v79_v10 = vrot.slane %v38_v4, %v78_v9  ;;  %p475_p5 = por %p474_p4, %p473_p3 }
  0x2d   :  { %v90_v12 = vrot.slane %v38_v4, %v89_v11  ;;  %v101_v14 = vrot.slane %v38_v4, %v100_v13  ;;  %v112_v16 = vrot.slane %v38_v4, %v111_v15  ;;  %v123_v18 = vrot.slane %v38_v4, %v122_v17 }
  0x2e   :  { %59 = vbcast.lane.b32.xlu1 %v57_v5, 256  ;;  %48 = vbcast.lane.b32.xlu0 %v46_v6, 256  ;;  %p476_p6 = pnand %p475_p5, %p469_p2 }
  0x32   :  { %63 = vbcast.lane.b32.xlu1 %v57_v5, 264  ;;  %52 = vbcast.lane.b32.xlu0 %v46_v6, 264 }
  0x36   :  { %74 = vbcast.lane.b32.xlu1 %v68_v8, 264  ;;  %70 = vbcast.lane.b32.xlu0 %v68_v8, 256 }
  0x3a   :  { %85 = vbcast.lane.b32.xlu1 %v79_v10, 264  ;;  %81 = vbcast.lane.b32.xlu0 %v79_v10, 256 }
  0x3e   :  { %96 = vbcast.lane.b32.xlu1 %v90_v12, 264  ;;  %92 = vbcast.lane.b32.xlu0 %v90_v12, 256 }
  0x42   :  { %107 = vbcast.lane.b32.xlu1 %v101_v14, 264  ;;  %103 = vbcast.lane.b32.xlu0 %v101_v14, 256 }
  0x46   :  { %118 = vbcast.lane.b32.xlu1 %v112_v16, 264  ;;  %114 = vbcast.lane.b32.xlu0 %v112_v16, 256 }
  0x4a   :  { %129 = vbcast.lane.b32.xlu1 %v123_v18, 264  ;;  %125 = vbcast.lane.b32.xlu0 %v123_v18, 256 }
  0xa0   :  { %v60_v19 = vpop.permute.xlu1 %59  ;;  %v49_v20 = vpop.permute.xlu0 %48 }
  0xa1   :  { %v556_v25 = vsel %vm41_vm0, %v60_v19, 1.0  ;;  %v560_v28 = vsel %vm41_vm0, %v49_v20, 1.0 }
  0xa2   :  { %376 = vlog2.f32 %v556_v25 }
  0xa3   :  { %378 = vlog2.f32 %v560_v28 }
  0xa4   :  { %v64_v23 = vpop.permute.xlu1 %63  ;;  %v53_v24 = vpop.permute.xlu0 %52 }
  0xa5   :  { %v564_v29 = vsel %vm42_vm1, %v64_v23, 1.0  ;;  %v569_v30 = vsel %vm42_vm1, %v53_v24, 1.0 }
  0xa6   :  { %380 = vlog2.f32 %v564_v29  ;;  %v158_v20 = vmin.f32 %v556_v25, %v564_v29 }
  0xa7   :  { %382 = vlog2.f32 %v569_v30 }
  0xa8   :  { %v75_v26 = vpop.permute.xlu1 %74  ;;  %v71_v27 = vpop.permute.xlu0 %70 }
  0xa9   :  { %v574_v31 = vsel %vm42_vm1, %v75_v26, 1.0  ;;  %v579_v34 = vsel %vm41_vm0, %v71_v27, 1.0 }
  0xaa   :  { %384 = vlog2.f32 %v574_v31 }
  0xab   :  { %386 = vlog2.f32 %v579_v34 }
  0xac   :  { %v86_v32 = vpop.permute.xlu1 %85  ;;  %v82_v33 = vpop.permute.xlu0 %81 }
  0xad   :  { %v584_v35 = vsel %vm42_vm1, %v86_v32, 1.0  ;;  %v589_v36 = vsel %vm41_vm0, %v82_v33, 1.0  ;;  %v377_v42 = vpop.eup %376  ;;  %v151_v32 = vmin.f32 %v560_v28, %v569_v30 }
  0xae   :  { %388 = vlog2.f32 %v584_v35  ;;  %v379_v44 = vpop.eup %378  ;;  %v212_v56 = vmul.f32 0.6931472, %v377_v42 }
  0xaf   :  { %390 = vlog2.f32 %v589_v36  ;;  %v208_v59 = vmul.f32 0.6931472, %v379_v44 }
  0xb0   :  { %v97_v37 = vpop.permute.xlu1 %96  ;;  %v93_v38 = vpop.permute.xlu0 %92 }
  0xb1   :  { %v595_v39 = vsel %vm42_vm1, %v97_v37, 1.0  ;;  %v599_v40 = vsel %vm41_vm0, %v93_v38, 1.0  ;;  %v381_v46 = vpop.eup %380 }
  0xb2   :  { %392 = vlog2.f32 %v595_v39  ;;  %v383_v47 = vpop.eup %382  ;;  %v214_v53 = vmul.f32 0.6931472, %v381_v46  ;;  %v152_v46 = vrot.slane %v151_v32, 4 }
  0xb3   :  { %394 = vlog2.f32 %v599_v40  ;;  %v210_v57 = vmul.f32 0.6931472, %v383_v47 }
  0xb4   :  { %v108_v41 = vpop.permute.xlu1 %107  ;;  %v104_v43 = vpop.permute.xlu0 %103  ;;  %v246_v2 = vadd.f32 %v214_v53, %v212_v56 }
  0xb5   :  { %v606_v45 = vsel %vm42_vm1, %v108_v41, 1.0  ;;  %v611_v48 = vsel %vm41_vm0, %v104_v43, 1.0  ;;  %v385_v49 = vpop.eup %384  ;;  %v239_v7 = vadd.f32 %v210_v57, %v208_v59  ;;  %v159_v43 = vrot.slane %v158_v20, 4 }
  0xb6   :  { %396 = vlog2.f32 %v606_v45  ;;  %v387_v50 = vpop.eup %386  ;;  %v218_v60 = vmul.f32 0.6931472, %v385_v49  ;;  %v247_v13 = vrot.slane %v246_v2, 4 }
  0xb7   :  { %398 = vlog2.f32 %v611_v48  ;;  %v216_v61 = vmul.f32 0.6931472, %v387_v50  ;;  %v240_v16 = vrot.slane %v239_v7, 4 }
  0xb8   :  { %v389_v51 = vpop.eup %388  ;;  %v119_v54 = vpop.permute.xlu1 %118  ;;  %v248_v27 = vadd.f32 %v247_v13, %v246_v2 }
  0xb9   :  { %v391_v52 = vpop.eup %390  ;;  %v222_v62 = vmul.f32 0.6931472, %v389_v51  ;;  %v616_v1 = vsel %vm42_vm1, %v119_v54, 1.0  ;;  %v115_v5 = vpop.permute.xlu0 %114  ;;  %v253_v8 = vadd.f32 %v218_v60, %v216_v61  ;;  %v241_v37 = vadd.f32 %v240_v16, %v239_v7 }
  0xba   :  { %v220_v63 = vmul.f32 0.6931472, %v391_v52  ;;  %400 = vlog2.f32 %v616_v1  ;;  %v621_v11 = vsel %vm41_vm0, %v115_v5, 1.0  ;;  %v249_v29 = vrot.slane %v248_v27, 2 }
  0xbb   :  { %v254_v18 = vrot.slane %v253_v8, 4  ;;  %402 = vlog2.f32 %v621_v11  ;;  %v242_v22 = vrot.slane %v241_v37, 2  ;;  %v160_v51 = vmin.f32 %v158_v20, %v159_v43 }
  0xbc   :  { %v393_v55 = vpop.eup %392  ;;  %v260_v9 = vadd.f32 %v222_v62, %v220_v63  ;;  %v130_v15 = vpop.permute.xlu1 %129  ;;  %v250_v53 = vadd.f32 %v249_v29, %v248_v27  ;;  %v632_v54 = vmin.f32 %v151_v32, %v152_v46  ;;  %v172_v60 = vmin.f32 %v589_v36, %v584_v35 }
  0xbd   :  { %v395_v58 = vpop.eup %394  ;;  %v226_v3 = vmul.f32 0.6931472, %v393_v55  ;;  %v126_v19 = vpop.permute.xlu0 %125  ;;  %v150_v26 = vsel %vm42_vm1, %v130_v15, 1.0  ;;  %v255_v42 = vadd.f32 %v254_v18, %v253_v8  ;;  %v243_v55 = vadd.f32 %v242_v22, %v241_v37 }
  0xbe   :  { %v224_v4 = vmul.f32 0.6931472, %v395_v58  ;;  %v261_v23 = vrot.slane %v260_v9, 4  ;;  %v149_v41 = vsel %vm41_vm0, %v126_v19, 1.0  ;;  %404 = vlog2.f32 %v150_v26 }
  0xbf   :  { %406 = vlog2.f32 %v149_v41  ;;  %v256_v50 = vrot.slane %v255_v42, 2  ;;  %v165_v58 = vmin.f32 %v579_v34, %v574_v31  ;;  %v161_v61 = vrot.slane %v160_v51, 2 }
  0xc0   :  { %v397_v6 = vpop.eup %396  ;;  %v267_v14 = vadd.f32 %v226_v3, %v224_v4  ;;  %v262_v44 = vadd.f32 %v261_v23, %v260_v9  ;;  %v251_v3 = vrot.slane %v250_v53, 1  ;;  %v154_v4 = vrot.slane %v632_v54, 2 }
  0xc1   :  { %v230_v10 = vmul.f32 0.6931472, %v397_v6  ;;  %v399_v12 = vpop.eup %398  ;;  %v257_v59 = vadd.f32 %v256_v50, %v255_v42  ;;  %v179_v5 = vmin.f32 %v599_v40, %v595_v39  ;;  %v244_v7 = vrot.slane %v243_v55, 1 }
  0xc2   :  { %v228_v17 = vmul.f32 0.6931472, %v399_v12  ;;  %v268_v33 = vrot.slane %v267_v14, 4  ;;  %v263_v28 = vrot.slane %v262_v44, 2  ;;  %v166_v34 = vrot.slane %v165_v58, 4 }
  0xc3   :  { %v258_v12 = vrot.slane %v257_v59, 1  ;;  %v173_v13 = vrot.slane %v172_v60, 4  ;;  %v186_v35 = vmin.f32 %v611_v48, %v606_v45  ;;  %v180_v39 = vrot.slane %v179_v5, 4 }
  0xc4   :  { %v274_v24 = vadd.f32 %v230_v10, %v228_v17  ;;  %v401_v25 = vpop.eup %400  ;;  %v269_v47 = vadd.f32 %v268_v33, %v267_v14  ;;  %v264_v62 = vadd.f32 %v263_v28, %v262_v44  ;;  %v193_v14 = vmin.f32 %v621_v11, %v616_v1 }
  0xc5   :  { %v234_v30 = vmul.f32 0.6931472, %v401_v25  ;;  %v403_v52 = vpop.eup %402  ;;  %v252_v17 = vadd.f32 %v251_v3, %v250_v53  ;;  %v200_v18 = vmin.f32 %v149_v41, %v150_v26  ;;  %v245_v19 = vadd.f32 %v244_v7, %v243_v55 }
  0xc6   :  { %v275_v38 = vrot.slane %v274_v24, 4  ;;  %v270_v21 = vrot.slane %v269_v47, 2  ;;  %v232_v57 = vmul.f32 0.6931472, %v403_v52  ;;  %v265_v36 = vrot.slane %v264_v62, 1 }
  0xc7   :  { %v167_v27 = vmin.f32 %v165_v58, %v166_v34  ;;  %v259_v32 = vadd.f32 %v258_v12, %v257_v59  ;;  %v174_v33 = vmin.f32 %v172_v60, %v173_v13  ;;  %v187_v37 = vrot.slane %v186_v35, 4 }
  0xc8   :  { %v276_v49 = vadd.f32 %v275_v38, %v274_v24  ;;  %v281_v63 = vadd.f32 %v234_v30, %v232_v57  ;;  %v405_v2 = vpop.eup %404  ;;  %v271_v6 = vadd.f32 %v270_v21, %v269_v47  ;;  %v266_v38 = vadd.f32 %v265_v36, %v264_v62 }
  0xc9   :  { %v238_v10 = vmul.f32 0.6931472, %v405_v2  ;;  %v407_v31 = vpop.eup %406  ;;  %v194_v45 = vrot.slane %v193_v14, 4  ;;  %v297_v43 = vmul.f32 1.442695, %v252_v17  ;;  %v181_v1 = vmin.f32 %v179_v5, %v180_v39 }
  0xca   :  { %v277_v56 = vrot.slane %v276_v49, 2  ;;  %v282_v9 = vrot.slane %v281_v63, 4  ;;  %v236_v16 = vmul.f32 0.6931472, %v407_v31  ;;  %v272_v40 = vrot.slane %v271_v6, 1 }
  0xcb   :  { %v201_v44 = vrot.slane %v200_v18, 4  ;;  %v295_v25 = vmul.f32 1.442695, %v245_v19  ;;  %v162_v41 = vmin.f32 %v160_v51, %v161_v61  ;;  %v168_v47 = vrot.slane %v167_v27, 2 }
  0xcc   :  { %v278_v8 = vadd.f32 %v277_v56, %v276_v49  ;;  %v283_v15 = vadd.f32 %v282_v9, %v281_v63  ;;  %v288_v24 = vadd.f32 %v238_v10, %v236_v16  ;;  %v273_v11 = vadd.f32 %v272_v40, %v271_v6 }
  0xcd   :  { %v299_v22 = vmul.f32 1.442695, %v259_v32  ;;  %v188_v49 = vmin.f32 %v186_v35, %v187_v37  ;;  %v301_v50 = vmul.f32 1.442695, %v266_v38  ;;  %v195_v28 = vmin.f32 %v193_v14, %v194_v45 }
  0xce   :  { %v279_v20 = vrot.slane %v278_v8, 1  ;;  %v284_v23 = vrot.slane %v283_v15, 2  ;;  %v289_v42 = vrot.slane %v288_v24, 4  ;;  %408 = vpow2.f32 %v297_v43 }
  0xcf   :  { %v175_v53 = vrot.slane %v174_v33, 2  ;;  %v303_v21 = vmul.f32 1.442695, %v273_v11  ;;  %v202_v55 = vmin.f32 %v200_v18, %v201_v44  ;;  %410 = vpow2.f32 %v295_v25 }
  0xd0   :  { %v285_v48 = vadd.f32 %v284_v23, %v283_v15  ;;  %v280_v29 = vadd.f32 %v279_v20, %v278_v8  ;;  %v290_v26 = vadd.f32 %v289_v42, %v288_v24  ;;  %v182_v56 = vrot.slane %v181_v1, 2 }
  0xd1   :  { %v155_v59 = vmin.f32 %v632_v54, %v154_v4  ;;  %412 = vpow2.f32 %v299_v22  ;;  %v189_v60 = vrot.slane %v188_v49, 2  ;;  %v169_v61 = vmin.f32 %v167_v27, %v168_v47 }
  0xd2   :  { %v286_v46 = vrot.slane %v285_v48, 1  ;;  %v291_v52 = vrot.slane %v290_v26, 2  ;;  %v305_v57 = vmul.f32 1.442695, %v280_v29  ;;  %414 = vpow2.f32 %v301_v50 }
  0xd3   :  { %v196_v62 = vrot.slane %v195_v28, 2  ;;  %v176_v2 = vmin.f32 %v174_v33, %v175_v53  ;;  %416 = vpow2.f32 %v303_v21  ;;  %v203_v3 = vrot.slane %v202_v55, 2 }
  0xd4   :  { %v287_v30 = vadd.f32 %v286_v46, %v285_v48  ;;  %v292_v58 = vadd.f32 %v291_v52, %v290_v26  ;;  %v183_v5 = vmin.f32 %v181_v1, %v182_v56  ;;  %418 = vpow2.f32 %v305_v57 }
  0xd5   :  { %v163_v7 = vrot.slane %v162_v41, 1  ;;  %v156_v8 = vrot.slane %v155_v59, 1  ;;  %v190_v9 = vmin.f32 %v188_v49, %v189_v60  ;;  %v170_v10 = vrot.slane %v169_v61, 1 }
  0xd6   :  { %v307_v51 = vmul.f32 1.442695, %v287_v30  ;;  %v293_v63 = vrot.slane %v292_v58, 1  ;;  %v197_v31 = vmin.f32 %v195_v28, %v196_v62  ;;  %v177_v4 = vrot.slane %v176_v2, 1 }
  0xd7   :  { %v204_v34 = vmin.f32 %v202_v55, %v203_v3  ;;  %v184_v12 = vrot.slane %v183_v5, 1  ;;  %v164_v35 = vmin.f32 %v162_v41, %v163_v7  ;;  %v157_v36 = vmin.f32 %v155_v59, %v156_v8 }
  0xd8   :  { %v294_v6 = vadd.f32 %v293_v63, %v292_v58  ;;  %420 = vpow2.f32 %v307_v51  ;;  %v409_v13 = vpop.eup %408  ;;  %v191_v14 = vrot.slane %v190_v9, 1  ;;  %v171_v16 = vmin.f32 %v169_v61, %v170_v10 }
  0xd9   :  { %v411_v15 = vpop.eup %410  ;;  %v198_v17 = vrot.slane %v197_v31, 1  ;;  %v178_v40 = vmin.f32 %v176_v2, %v177_v4  ;;  %v205_v18 = vrot.slane %v204_v34, 1  ;;  %v185_v20 = vmin.f32 %v183_v5, %v184_v12 }
  0xda   :  { %v309_v54 = vmul.f32 1.442695, %v294_v6  ;;  %v323_v24 = vsel %vm322_vm2, %v164_v35, %v157_v36  ;;  %v345_v27 = vsel %vm322_vm2, %v409_v13, %v411_v15  ;;  %v192_v32 = vmin.f32 %v190_v9, %v191_v14 }
  0xdb   :  { %v413_v39 = vpop.eup %412  ;;  %v312_v33 = vand.u32 127, %v43_v0  ;;  %v325_v38 = vsel %vm324_vm3, %v171_v16, %v323_v24  ;;  %v199_v45 = vmin.f32 %v197_v31, %v198_v17  ;;  %v206_v1 = vmin.f32 %v204_v34, %v205_v18 }
  0xdc   :  { %422 = vpow2.f32 %v309_v54  ;;  %v415_v19 = vpop.eup %414  ;;  %v346_v48 = vsel %vm324_vm3, %v413_v39, %v345_v27  ;;  %v327_v43 = vsel %vm326_vm4, %v178_v40, %v325_v38 }
  0xdd   :  { %v417_v23 = vpop.eup %416  ;;  %v347_v11 = vsel %vm326_vm4, %v415_v19, %v346_v48  ;;  %v329_v44 = vsel %vm328_vm5, %v185_v20, %v327_v43  ;;  %vm313_vm9 = vcmp.lt.s32.totalorder %v312_v33, 4 }
  0xde   :  { %v419_v37 = vpop.eup %418  ;;  %v348_v25 = vsel %vm328_vm5, %v417_v23, %v347_v11  ;;  %v331_v0 = vsel %vm330_vm6, %v192_v32, %v329_v44 }
  0xdf   :  { %v349_v29 = vsel %vm330_vm6, %v419_v37, %v348_v25  ;;  %v333_v26 = vsel %vm332_vm7, %v199_v45, %v331_v0 }
  0xe0   :  { %v335_v47 = vsel %vm334_vm8, %v206_v1, %v333_v26 }
  0xe2   :  { %v421_v42 = vpop.eup %420 }
  0xe3   :  { %v350_v41 = vsel %vm332_vm7, %v421_v42, %v349_v29 }
  0xe6   :  { %v423_v46 = vpop.eup %422 }
  0xe7   :  { %v351_v22 = vsel %vm334_vm8, %v423_v46, %v350_v41 }
  0xe8   :  { %v353_v49 = vsel %vm313_vm9, %v335_v47, %v351_v22 }
  0xe9   :  { %354 = vst [vmem:[#allocation7] sm:$0xff] %v353_v49 }
  0xea   :  { %479 = shalt.err (!%p476_p6)
}
  0xeb   :  { %s480_s10 = scalar_lea.hbm %s667_s2, 128 }
  0xec   :  { %p481_p7 = scmp.ne.s32.totalorder %s667_s2, %s480_s10  ;;  %p484_p8 = scmp.lt.u32.totalorder %s480_s10, %s667_s2 }
  0xee   :  { %p486_p9 = pnand %p484_p8, %p481_p7 }
  0xf0   :  { %489 = shalt.err (!%p486_p9)
}
  0xf1   :  { %364 = dma.vmem_to_hbm [thread:$0]  %s362_s6, 128, %s667_s2, [#allocation4]  }
  0xf2   :  { %494 = dma.done.wait [#allocation4], 128  }
  0xf3   :  { %495 = vsyncadd [#allocation4], 4294967168 }
  0xf4   :  { %368 = vsyncpa [#allocation3], 1 }
  0xf5   :  { %369 = vsyncpa [#allocation6], 1 }
  0xf6   :  { %370 = vsyncpa [#allocation4], 1 }

</bundles_post_ra>
